<compile_context>
chip_gen: v6e
topology: v6e:2x2x1
jax: 0.10.0
libtpu: 0.0.40
codegen_flags: <defaults>
</compile_context>

<pallas_src>
import functools

import jax
import jax.numpy as jnp
from jax import lax
from jax.experimental import pallas as pl
from jax.experimental.pallas import tpu as pltpu


def _round_up(v, m):
    return ((v + m - 1) // m) * m


def _cdiv(a, b):
    return -(-a // b)


# ----------------------------------------------------------------------------
# Pallas kernel: one (Cout-tile, batch, spatial-tile) grid step.
# Fused im2col (VMEM slab) + single GEMM + bias, lane-dense NCHW-flat output.
# ----------------------------------------------------------------------------
def _conv_t_kernel(xm_ref, xh_ref, w_ref, b_ref, o_ref, slab_ref, *,
                   offsets, cin, tm):
    # xm_ref  : (1, Cin, TM)        bf16  main flat-spatial window
    # xh_ref  : (1, Cin, HALO_BLK)  bf16  halo columns right after the window
    # w_ref   : (TCO, K*K*Cin)      bf16  fused (tap-major) forward-conv weights
    # b_ref   : (TCO, 1)            f32   bias
    # o_ref   : (1, TCO, TM)              output tile (lane-dense, NCHW-flat)
    # slab_ref: (K*K*Cin, TM)       bf16  VMEM im2col slab
    for t, off in enumerate(offsets):          # K*K static shifted windows
        r0 = t * cin
        if off == 0:
            slab_ref[r0:r0 + cin, :] = xm_ref[0]
        elif off < tm:
            slab_ref[r0:r0 + cin, :tm - off] = xm_ref[0, :, off:]
            slab_ref[r0:r0 + cin, tm - off:] = xh_ref[0, :, :off]
        else:  # off == tm (only when TM collapses to HALO_BLK)
            slab_ref[r0:r0 + cin, :] = xh_ref[0, :, :tm]

    # Single MXU GEMM over the fused (K*K*Cin) contraction, f32 accumulation.
    out = jnp.dot(w_ref[...], slab_ref[...], preferred_element_type=jnp.float32)
    o_ref[0] = (out + b_ref[...]).astype(o_ref.dtype)


# ----------------------------------------------------------------------------
# Wrapper: ConvTranspose2d forward
# ----------------------------------------------------------------------------
@functools.partial(jax.jit, static_argnames=("stride", "padding"))
def conv_transpose2d_pallas(x, weight, bias, *, stride=1, padding=0):
    """x: (N, Cin, H, W); weight: (Cin, Cout, K, K) [PyTorch ConvTranspose2d
    layout]; bias: (Cout,) or None.  Returns (N, Cout, Hout, Wout)."""
    N, Cin, H, W = x.shape
    w_cin, Cout, KH, KW = weight.shape
    assert Cin == w_cin and KH == KW
    K, s, p = KH, stride, padding
    assert 0 <= p <= K - 1  # TODO(synk): padding > K-1 / output_padding unsupported
    pad = K - 1 - p
    Hup, Wup = (H - 1) * s + 1, (W - 1) * s + 1
    Hpad, Wpad = Hup + 2 * pad, Wup + 2 * pad
    Hout, Wout = Hpad - K + 1, Wpad - K + 1        # == (H-1)*s - 2p + K

    # ---- tiling over the flattened (row-stride = Wpad) output ---------------
    L_full = Hout * Wpad                           # valid flat output length
    halo = (K - 1) * (Wpad + 1)                    # largest in-tile window shift
    HALO_BLK = max(128, _round_up(halo, 128))      # small halo block (not TM)
    TM = HALO_BLK * max(1, min(512 // HALO_BLK, _cdiv(L_full, HALO_BLK)))
    NUMT = _cdiv(L_full, TM)
    Lout = NUMT * TM
    hblocks = TM // HALO_BLK                       # exact by construction

    # ---- glue: zero-dilate + pad, channels-first, flattened spatial ---------
    Hrows = _cdiv(NUMT * TM + HALO_BLK, Wpad)      # rows so main+halo windows fit
    xin = jnp.zeros((N, Cin, Hrows, Wpad), jnp.bfloat16)
    xin = xin.at[:, :, pad:pad + Hup:s, pad:pad + Wup:s].set(x.astype(jnp.bfloat16))
    xin = xin.reshape(N, Cin, Hrows * Wpad)

    # ConvTranspose weight -> fused (Cout, K*K*Cin) forward-conv weight with
    # flipped taps; row order (tap-major, then Cin) matches the im2col slab.
    KKC = K * K * Cin
    w2 = jnp.transpose(weight[:, :, ::-1, ::-1], (1, 2, 3, 0))  # (Cout,K,K,Cin)
    w2 = w2.reshape(Cout, KKC).astype(jnp.bfloat16)

    if bias is None:
        bias = jnp.zeros((Cout,), jnp.float32)
    bias2d = bias.astype(jnp.float32).reshape(Cout, 1)

    # ---- Cout tiling: keep the full weight resident whenever it fits --------
    out_isz = jnp.dtype(x.dtype).itemsize

    def _vmem_bytes(tco):
        return (2 * tco * KKC * 2                   # weights (bf16, dbl-buffered)
                + 2 * tco * TM * out_isz            # output tile
                + 2 * Cin * (TM + HALO_BLK) * 2     # inputs (main + halo)
                + KKC * TM * 2                      # im2col slab scratch
                + 2 * tco * 4)                      # bias

    VMEM_BUDGET = 40 * 1024 * 1024                  # conservative: v7x 64 MiB/TC
    if _vmem_bytes(Cout) <= VMEM_BUDGET:
        TCO = Cout                                  # full residency, CT == 1
    else:
        TCO = next((t for t in (512, 384, 256, 128, 64)
                    if Cout % t == 0 and _vmem_bytes(t) <= VMEM_BUDGET), Cout)
    CT = Cout // TCO
    vmem_limit = int(min(48 * 1024 * 1024,
                         max(32 * 1024 * 1024, _vmem_bytes(TCO) + (8 << 20))))

    offsets = tuple(dh * Wpad + dw for dh in range(K) for dw in range(K))
    kernel = functools.partial(_conv_t_kernel, offsets=offsets, cin=Cin, tm=TM)

    out_flat = pl.pallas_call(
        kernel,
        out_shape=jax.ShapeDtypeStruct((N, Cout, Lout), x.dtype),
        # Cout-tile axis outermost: each weight tile is DMA'd exactly once.
        grid=(CT, N, NUMT),
        in_specs=[
            pl.BlockSpec((1, Cin, TM), lambda c, n, m: (n, 0, m)),            # main
            pl.BlockSpec((1, Cin, HALO_BLK),
                         lambda c, n, m: (n, 0, (m + 1) * hblocks)),          # halo
            pl.BlockSpec((TCO, KKC), lambda c, n, m: (c, 0)),                 # weights
            pl.BlockSpec((TCO, 1), lambda c, n, m: (c, 0)),                   # bias
        ],
        out_specs=pl.BlockSpec((1, TCO, TM), lambda c, n, m: (n, c, m)),
        scratch_shapes=[pltpu.VMEM((KKC, TM), jnp.bfloat16)],
        compiler_params=pltpu.CompilerParams(
            dimension_semantics=("parallel", "parallel", "parallel"),
            vmem_limit_bytes=vmem_limit,
        ),
    )(xin, xin, w2, bias2d)

    # Already NCHW (channel-major, spatial-minor); crop the K-1 junk columns
    # per output row (padded row stride Wpad -> Wout).  Reshape is metadata-only.
    out = out_flat[:, :, :L_full].reshape(N, Cout, Hout, Wpad)[:, :, :, :Wout]
    return out


# ----------------------------------------------------------------------------
# Deterministic parameter init (mirrors nn.ConvTranspose2d.reset_parameters:
# kaiming_uniform(a=sqrt(5)) => U(-1/sqrt(fan_in), 1/sqrt(fan_in)))
# ----------------------------------------------------------------------------
def init_params(key, in_channels, out_channels, kernel_size, use_bias=True):
    kw, kb = jax.random.split(key)
    fan_in = out_channels * kernel_size * kernel_size
    bound = 1.0 / (fan_in ** 0.5)
    weight = jax.random.uniform(
        kw, (in_channels, out_channels, kernel_size, kernel_size),
        dtype=jnp.float32, minval=-bound, maxval=bound)
    bias = (jax.random.uniform(kb, (out_channels,), dtype=jnp.float32,
                               minval=-bound, maxval=bound)
            if use_bias else None)
    return weight, bias


# ----------------------------------------------------------------------------
def _reference(x, weight, bias, stride, padding):
    """XLA reference: conv-transpose as lhs-dilated conv with flipped kernel."""
    K = weight.shape[-1]
    w_conv = jnp.transpose(weight[:, :, ::-1, ::-1], (1, 0, 2, 3))  # (Cout,Cin,K,K)
    pad = K - 1 - padding
    y = lax.conv_general_dilated(
        x, w_conv, window_strides=(1, 1),
        padding=[(pad, pad), (pad, pad)],
        lhs_dilation=(stride, stride), rhs_dilation=(1, 1),
        dimension_numbers=("NCHW", "OIHW", "NCHW"),
        precision=lax.Precision.HIGHEST)
    if bias is not None:
        y = y + bias[None, :, None, None]
    return y


if __name__ == "__main__":
    # Small shapes consistent with the module: batch=2, Cin=4, Cout=8,
    # kernel_size=3, stride=2, padding=1, 16x16 spatial.
    N, Cin, Cout, K, S, P, H, W = 2, 4, 8, 3, 2, 1, 16, 16

    key = jax.random.PRNGKey(0)
    kx, kp = jax.random.split(key)
    x = jax.random.normal(kx, (N, Cin, H, W), dtype=jnp.float32)
    weight, bias = init_params(kp, Cin, Cout, K, use_bias=True)

    out = conv_transpose2d_pallas(x, weight, bias, stride=S, padding=P)
    out = jax.block_until_ready(out)

    expected_shape = (N, Cout, (H - 1) * S - 2 * P + K, (W - 1) * S - 2 * P + K)
    assert out.shape == expected_shape, (out.shape, expected_shape)

    # Numerics: the kernel feeds the MXU bf16 operands with f32 accumulation,
    # so compare against the XLA reference evaluated on bf16-rounded inputs
    # (remaining differences are accumulation-order only).
    xb = x.astype(jnp.bfloat16).astype(jnp.float32)
    wb = weight.astype(jnp.bfloat16).astype(jnp.float32)
    ref = _reference(xb, wb, bias, S, P)
    if not jnp.allclose(out, ref, atol=2e-3, rtol=2e-3):
        raise AssertionError(
            f"mismatch: max abs err {float(jnp.max(jnp.abs(out - ref)))}")

    print("KERNEL_OK")
</pallas_src>

<mosaic_0001>
module attributes {stable_mosaic.version = 11 : i64} {
  func.func @_conv_t_kernel(%arg0: i32, %arg1: i32, %arg2: i32, %arg3: memref<1x4x512xbf16, #tpu.memory_space<vmem>>, %arg4: memref<1x4x128xbf16, #tpu.memory_space<vmem>>, %arg5: memref<8x36xbf16, #tpu.memory_space<vmem>>, %arg6: memref<8x1xf32, #tpu.memory_space<vmem>>, %arg7: memref<1x8x512xf32, #tpu.memory_space<vmem>>, %arg8: memref<36x512xbf16, #tpu.memory_space<vmem>>) attributes {dimension_semantics = [#tpu.dimension_semantics<parallel>, #tpu.dimension_semantics<parallel>, #tpu.dimension_semantics<parallel>], iteration_bounds = array<i64: 1, 2, 2>, scalar_prefetch = 0 : i64, scratch_operands = 1 : i64, tpu.core_type = #tpu.core_type<tc>, window_params = [{transform_indices = @transform_0, window_bounds = array<i64: 1, 4, 512>}, {transform_indices = @transform_1, window_bounds = array<i64: 1, 4, 128>}, {transform_indices = @transform_2, window_bounds = array<i64: 8, 36>}, {transform_indices = @transform_3, window_bounds = array<i64: 8, 1>}, {transform_indices = @transform_4, window_bounds = array<i64: 1, 8, 512>}]} {
    %c0 = arith.constant 0 : index
    %c0_0 = arith.constant 0 : index
    %c0_1 = arith.constant 0 : index
    %0 = vector.load %arg3[%c0, %c0_0, %c0_1] : memref<1x4x512xbf16, #tpu.memory_space<vmem>>, vector<1x4x512xbf16>
    %1 = vector.shape_cast %0 : vector<1x4x512xbf16> to vector<4x512xbf16>
    %c0_2 = arith.constant 0 : index
    %c0_3 = arith.constant 0 : index
    %2 = vector.load %arg8[%c0_2, %c0_3] : memref<36x512xbf16, #tpu.memory_space<vmem>>, vector<4x512xbf16>
    tpu.vector_store %arg8[%c0_2, %c0_3], %1 {strides = array<i32>} : memref<36x512xbf16, #tpu.memory_space<vmem>>, vector<4x512xbf16>,
    %c0_4 = arith.constant 0 : index
    %c0_5 = arith.constant 0 : index
    %c1 = arith.constant 1 : index
    %3 = vector.load %arg3[%c0_4, %c0_5, %c1] : memref<1x4x512xbf16, #tpu.memory_space<vmem>>, vector<1x4x511xbf16>
    %4 = vector.shape_cast %3 : vector<1x4x511xbf16> to vector<4x511xbf16>
    %c4 = arith.constant 4 : index
    %c0_6 = arith.constant 0 : index
    %5 = vector.load %arg8[%c4, %c0_6] : memref<36x512xbf16, #tpu.memory_space<vmem>>, vector<4x511xbf16>
    tpu.vector_store %arg8[%c4, %c0_6], %4 {strides = array<i32>} : memref<36x512xbf16, #tpu.memory_space<vmem>>, vector<4x511xbf16>,
    %c0_7 = arith.constant 0 : index
    %c0_8 = arith.constant 0 : index
    %c0_9 = arith.constant 0 : index
    %6 = vector.load %arg4[%c0_7, %c0_8, %c0_9] : memref<1x4x128xbf16, #tpu.memory_space<vmem>>, vector<1x4x1xbf16>
    %7 = vector.shape_cast %6 : vector<1x4x1xbf16> to vector<4x1xbf16>
    %c4_10 = arith.constant 4 : index
    %c511 = arith.constant 511 : index
    %8 = vector.load %arg8[%c4_10, %c511] : memref<36x512xbf16, #tpu.memory_space<vmem>>, vector<4x1xbf16>
    tpu.vector_store %arg8[%c4_10, %c511], %7 {strides = array<i32>} : memref<36x512xbf16, #tpu.memory_space<vmem>>, vector<4x1xbf16>,
    %c0_11 = arith.constant 0 : index
    %c0_12 = arith.constant 0 : index
    %c2 = arith.constant 2 : index
    %9 = vector.load %arg3[%c0_11, %c0_12, %c2] : memref<1x4x512xbf16, #tpu.memory_space<vmem>>, vector<1x4x510xbf16>
    %10 = vector.shape_cast %9 : vector<1x4x510xbf16> to vector<4x510xbf16>
    %c8 = arith.constant 8 : index
    %c0_13 = arith.constant 0 : index
    %11 = vector.load %arg8[%c8, %c0_13] : memref<36x512xbf16, #tpu.memory_space<vmem>>, vector<4x510xbf16>
    tpu.vector_store %arg8[%c8, %c0_13], %10 {strides = array<i32>} : memref<36x512xbf16, #tpu.memory_space<vmem>>, vector<4x510xbf16>,
    %c0_14 = arith.constant 0 : index
    %c0_15 = arith.constant 0 : index
    %c0_16 = arith.constant 0 : index
    %12 = vector.load %arg4[%c0_14, %c0_15, %c0_16] : memref<1x4x128xbf16, #tpu.memory_space<vmem>>, vector<1x4x2xbf16>
    %13 = vector.shape_cast %12 : vector<1x4x2xbf16> to vector<4x2xbf16>
    %c8_17 = arith.constant 8 : index
    %c510 = arith.constant 510 : index
    %14 = vector.load %arg8[%c8_17, %c510] : memref<36x512xbf16, #tpu.memory_space<vmem>>, vector<4x2xbf16>
    tpu.vector_store %arg8[%c8_17, %c510], %13 {strides = array<i32>} : memref<36x512xbf16, #tpu.memory_space<vmem>>, vector<4x2xbf16>,
    %c0_18 = arith.constant 0 : index
    %c0_19 = arith.constant 0 : index
    %c33 = arith.constant 33 : index
    %15 = vector.load %arg3[%c0_18, %c0_19, %c33] : memref<1x4x512xbf16, #tpu.memory_space<vmem>>, vector<1x4x479xbf16>
    %16 = vector.shape_cast %15 : vector<1x4x479xbf16> to vector<4x479xbf16>
    %c12 = arith.constant 12 : index
    %c0_20 = arith.constant 0 : index
    %17 = vector.load %arg8[%c12, %c0_20] : memref<36x512xbf16, #tpu.memory_space<vmem>>, vector<4x479xbf16>
    tpu.vector_store %arg8[%c12, %c0_20], %16 {strides = array<i32>} : memref<36x512xbf16, #tpu.memory_space<vmem>>, vector<4x479xbf16>,
    %c0_21 = arith.constant 0 : index
    %c0_22 = arith.constant 0 : index
    %c0_23 = arith.constant 0 : index
    %18 = vector.load %arg4[%c0_21, %c0_22, %c0_23] : memref<1x4x128xbf16, #tpu.memory_space<vmem>>, vector<1x4x33xbf16>
    %19 = vector.shape_cast %18 : vector<1x4x33xbf16> to vector<4x33xbf16>
    %c12_24 = arith.constant 12 : index
    %c479 = arith.constant 479 : index
    %20 = vector.load %arg8[%c12_24, %c479] : memref<36x512xbf16, #tpu.memory_space<vmem>>, vector<4x33xbf16>
    tpu.vector_store %arg8[%c12_24, %c479], %19 {strides = array<i32>} : memref<36x512xbf16, #tpu.memory_space<vmem>>, vector<4x33xbf16>,
    %c0_25 = arith.constant 0 : index
    %c0_26 = arith.constant 0 : index
    %c34 = arith.constant 34 : index
    %21 = vector.load %arg3[%c0_25, %c0_26, %c34] : memref<1x4x512xbf16, #tpu.memory_space<vmem>>, vector<1x4x478xbf16>
    %22 = vector.shape_cast %21 : vector<1x4x478xbf16> to vector<4x478xbf16>
    %c16 = arith.constant 16 : index
    %c0_27 = arith.constant 0 : index
    %23 = vector.load %arg8[%c16, %c0_27] : memref<36x512xbf16, #tpu.memory_space<vmem>>, vector<4x478xbf16>
    tpu.vector_store %arg8[%c16, %c0_27], %22 {strides = array<i32>} : memref<36x512xbf16, #tpu.memory_space<vmem>>, vector<4x478xbf16>,
    %c0_28 = arith.constant 0 : index
    %c0_29 = arith.constant 0 : index
    %c0_30 = arith.constant 0 : index
    %24 = vector.load %arg4[%c0_28, %c0_29, %c0_30] : memref<1x4x128xbf16, #tpu.memory_space<vmem>>, vector<1x4x34xbf16>
    %25 = vector.shape_cast %24 : vector<1x4x34xbf16> to vector<4x34xbf16>
    %c16_31 = arith.constant 16 : index
    %c478 = arith.constant 478 : index
    %26 = vector.load %arg8[%c16_31, %c478] : memref<36x512xbf16, #tpu.memory_space<vmem>>, vector<4x34xbf16>
    tpu.vector_store %arg8[%c16_31, %c478], %25 {strides = array<i32>} : memref<36x512xbf16, #tpu.memory_space<vmem>>, vector<4x34xbf16>,
    %c0_32 = arith.constant 0 : index
    %c0_33 = arith.constant 0 : index
    %c35 = arith.constant 35 : index
    %27 = vector.load %arg3[%c0_32, %c0_33, %c35] : memref<1x4x512xbf16, #tpu.memory_space<vmem>>, vector<1x4x477xbf16>
    %28 = vector.shape_cast %27 : vector<1x4x477xbf16> to vector<4x477xbf16>
    %c20 = arith.constant 20 : index
    %c0_34 = arith.constant 0 : index
    %29 = vector.load %arg8[%c20, %c0_34] : memref<36x512xbf16, #tpu.memory_space<vmem>>, vector<4x477xbf16>
    tpu.vector_store %arg8[%c20, %c0_34], %28 {strides = array<i32>} : memref<36x512xbf16, #tpu.memory_space<vmem>>, vector<4x477xbf16>,
    %c0_35 = arith.constant 0 : index
    %c0_36 = arith.constant 0 : index
    %c0_37 = arith.constant 0 : index
    %30 = vector.load %arg4[%c0_35, %c0_36, %c0_37] : memref<1x4x128xbf16, #tpu.memory_space<vmem>>, vector<1x4x35xbf16>
    %31 = vector.shape_cast %30 : vector<1x4x35xbf16> to vector<4x35xbf16>
    %c20_38 = arith.constant 20 : index
    %c477 = arith.constant 477 : index
    %32 = vector.load %arg8[%c20_38, %c477] : memref<36x512xbf16, #tpu.memory_space<vmem>>, vector<4x35xbf16>
    tpu.vector_store %arg8[%c20_38, %c477], %31 {strides = array<i32>} : memref<36x512xbf16, #tpu.memory_space<vmem>>, vector<4x35xbf16>,
    %c0_39 = arith.constant 0 : index
    %c0_40 = arith.constant 0 : index
    %c66 = arith.constant 66 : index
    %33 = vector.load %arg3[%c0_39, %c0_40, %c66] : memref<1x4x512xbf16, #tpu.memory_space<vmem>>, vector<1x4x446xbf16>
    %34 = vector.shape_cast %33 : vector<1x4x446xbf16> to vector<4x446xbf16>
    %c24 = arith.constant 24 : index
    %c0_41 = arith.constant 0 : index
    %35 = vector.load %arg8[%c24, %c0_41] : memref<36x512xbf16, #tpu.memory_space<vmem>>, vector<4x446xbf16>
    tpu.vector_store %arg8[%c24, %c0_41], %34 {strides = array<i32>} : memref<36x512xbf16, #tpu.memory_space<vmem>>, vector<4x446xbf16>,
    %c0_42 = arith.constant 0 : index
    %c0_43 = arith.constant 0 : index
    %c0_44 = arith.constant 0 : index
    %36 = vector.load %arg4[%c0_42, %c0_43, %c0_44] : memref<1x4x128xbf16, #tpu.memory_space<vmem>>, vector<1x4x66xbf16>
    %37 = vector.shape_cast %36 : vector<1x4x66xbf16> to vector<4x66xbf16>
    %c24_45 = arith.constant 24 : index
    %c446 = arith.constant 446 : index
    %38 = vector.load %arg8[%c24_45, %c446] : memref<36x512xbf16, #tpu.memory_space<vmem>>, vector<4x66xbf16>
    tpu.vector_store %arg8[%c24_45, %c446], %37 {strides = array<i32>} : memref<36x512xbf16, #tpu.memory_space<vmem>>, vector<4x66xbf16>,
    %c0_46 = arith.constant 0 : index
    %c0_47 = arith.constant 0 : index
    %c67 = arith.constant 67 : index
    %39 = vector.load %arg3[%c0_46, %c0_47, %c67] : memref<1x4x512xbf16, #tpu.memory_space<vmem>>, vector<1x4x445xbf16>
    %40 = vector.shape_cast %39 : vector<1x4x445xbf16> to vector<4x445xbf16>
    %c28 = arith.constant 28 : index
    %c0_48 = arith.constant 0 : index
    %41 = vector.load %arg8[%c28, %c0_48] : memref<36x512xbf16, #tpu.memory_space<vmem>>, vector<4x445xbf16>
    tpu.vector_store %arg8[%c28, %c0_48], %40 {strides = array<i32>} : memref<36x512xbf16, #tpu.memory_space<vmem>>, vector<4x445xbf16>,
    %c0_49 = arith.constant 0 : index
    %c0_50 = arith.constant 0 : index
    %c0_51 = arith.constant 0 : index
    %42 = vector.load %arg4[%c0_49, %c0_50, %c0_51] : memref<1x4x128xbf16, #tpu.memory_space<vmem>>, vector<1x4x67xbf16>
    %43 = vector.shape_cast %42 : vector<1x4x67xbf16> to vector<4x67xbf16>
    %c28_52 = arith.constant 28 : index
    %c445 = arith.constant 445 : index
    %44 = vector.load %arg8[%c28_52, %c445] : memref<36x512xbf16, #tpu.memory_space<vmem>>, vector<4x67xbf16>
    tpu.vector_store %arg8[%c28_52, %c445], %43 {strides = array<i32>} : memref<36x512xbf16, #tpu.memory_space<vmem>>, vector<4x67xbf16>,
    %c0_53 = arith.constant 0 : index
    %c0_54 = arith.constant 0 : index
    %c68 = arith.constant 68 : index
    %45 = vector.load %arg3[%c0_53, %c0_54, %c68] : memref<1x4x512xbf16, #tpu.memory_space<vmem>>, vector<1x4x444xbf16>
    %46 = vector.shape_cast %45 : vector<1x4x444xbf16> to vector<4x444xbf16>
    %c32 = arith.constant 32 : index
    %c0_55 = arith.constant 0 : index
    %47 = vector.load %arg8[%c32, %c0_55] : memref<36x512xbf16, #tpu.memory_space<vmem>>, vector<4x444xbf16>
    tpu.vector_store %arg8[%c32, %c0_55], %46 {strides = array<i32>} : memref<36x512xbf16, #tpu.memory_space<vmem>>, vector<4x444xbf16>,
    %c0_56 = arith.constant 0 : index
    %c0_57 = arith.constant 0 : index
    %c0_58 = arith.constant 0 : index
    %48 = vector.load %arg4[%c0_56, %c0_57, %c0_58] : memref<1x4x128xbf16, #tpu.memory_space<vmem>>, vector<1x4x68xbf16>
    %49 = vector.shape_cast %48 : vector<1x4x68xbf16> to vector<4x68xbf16>
    %c32_59 = arith.constant 32 : index
    %c444 = arith.constant 444 : index
    %50 = vector.load %arg8[%c32_59, %c444] : memref<36x512xbf16, #tpu.memory_space<vmem>>, vector<4x68xbf16>
    tpu.vector_store %arg8[%c32_59, %c444], %49 {strides = array<i32>} : memref<36x512xbf16, #tpu.memory_space<vmem>>, vector<4x68xbf16>,
    %c0_60 = arith.constant 0 : index
    %c0_61 = arith.constant 0 : index
    %51 = vector.load %arg5[%c0_60, %c0_61] : memref<8x36xbf16, #tpu.memory_space<vmem>>, vector<8x36xbf16>
    %c0_62 = arith.constant 0 : index
    %c0_63 = arith.constant 0 : index
    %52 = vector.load %arg8[%c0_62, %c0_63] : memref<36x512xbf16, #tpu.memory_space<vmem>>, vector<36x512xbf16>
    %cst = arith.constant dense<0.000000e+00> : vector<8x512xf32>
    %53 = tpu.matmul %51, %52, %cst {dimension_numbers = #tpu.dot_dimension_numbers<[1], [0], [0], [1], [0, 0, 1, 1], [], []>} : vector<8x36xbf16>, vector<36x512xbf16>, vector<8x512xf32> -> vector<8x512xf32>
    %c0_64 = arith.constant 0 : index
    %c0_65 = arith.constant 0 : index
    %54 = vector.load %arg6[%c0_64, %c0_65] : memref<8x1xf32, #tpu.memory_space<vmem>>, vector<8x1xf32>
    %55 = vector.broadcast %54 : vector<8x1xf32> to vector<8x512xf32>
    %56 = arith.addf %53, %55 : vector<8x512xf32>
    %c0_66 = arith.constant 0 : index
    %c0_67 = arith.constant 0 : index
    %c0_68 = arith.constant 0 : index
    %57 = vector.load %arg7[%c0_66, %c0_67, %c0_68] : memref<1x8x512xf32, #tpu.memory_space<vmem>>, vector<1x8x512xf32>
    %58 = vector.shape_cast %57 : vector<1x8x512xf32> to vector<8x512xf32>
    %59 = vector.shape_cast %56 : vector<8x512xf32> to vector<1x8x512xf32>
    tpu.vector_store %arg7[%c0_66, %c0_67, %c0_68], %59 {strides = array<i32>} : memref<1x8x512xf32, #tpu.memory_space<vmem>>, vector<1x8x512xf32>,
    return
  }
  func.func @transform_0(%arg0: i32, %arg1: i32, %arg2: i32) -> (i32, i32, i32) {
    %c0_i32 = arith.constant 0 : i32
    %c0_i32_0 = arith.constant 0 : i32
    return %arg1, %c0_i32, %arg2 : i32, i32, i32
  }
  func.func @transform_1(%arg0: i32, %arg1: i32, %arg2: i32) -> (i32, i32, i32) {
    %c1_i32 = arith.constant 1 : i32
    %0 = arith.addi %arg2, %c1_i32 : i32
    %c4_i32 = arith.constant 4 : i32
    %1 = arith.muli %0, %c4_i32 : i32
    %c0_i32 = arith.constant 0 : i32
    %c0_i32_0 = arith.constant 0 : i32
    return %arg1, %c0_i32, %1 : i32, i32, i32
  }
  func.func @transform_2(%arg0: i32, %arg1: i32, %arg2: i32) -> (i32, i32) {
    %c0_i32 = arith.constant 0 : i32
    %c0_i32_0 = arith.constant 0 : i32
    return %arg0, %c0_i32 : i32, i32
  }
  func.func @transform_3(%arg0: i32, %arg1: i32, %arg2: i32) -> (i32, i32) {
    %c0_i32 = arith.constant 0 : i32
    %c0_i32_0 = arith.constant 0 : i32
    return %arg0, %c0_i32 : i32, i32
  }
  func.func @transform_4(%arg0: i32, %arg1: i32, %arg2: i32) -> (i32, i32, i32) {
    %c0_i32 = arith.constant 0 : i32
    return %arg1, %arg0, %arg2 : i32, i32, i32
  }
}

</mosaic_0001>

<bundles_post_ra>
// kernel: conv_transpose2d_pallas.1
= control target key start
LH: loop header
LB: loop body
LE: loop exit
PB: predicated region body
PF: predicated region fallthrough
CT: control target
= control target key end

     0   :  { %s1279_s15 = smov 0   ;;  %s1281_s16 = smov 0   ;;  %s1390_s0 = inlined_call_operand.vmem [shape: bf16[2,4,1155], index: 0, kind: input, shape index: {}, may-alias: {0,1}]   ;;  %s1391_s1 = inlined_call_operand.vmem [shape: bf16[2,4,1155], index: 1, kind: input, shape index: {}, may-alias: {0,1}]   ;;  %s1392_s2 = inlined_call_operand.vmem [shape: bf16[8,36], index: 2, kind: input, shape index: {}]   ;;  %s1393_s3 = inlined_call_operand.vmem [shape: f32[8,1], index: 3, kind: input, shape index: {}]   ;;  %s1394_s4 = inlined_call_operand.vmem [shape: f32[2,8,1024], index: 4, kind: output, shape index: {}]  }
   0x1   :  { %s1283_s17 = smov 0   ;;  %s1285_s18 = smov 0  }
   0x2   :  { %s1287_s19 = smov 0  }
   0x3 LB: > { %s26_s20 = sadd.s32 1, %s1234_s17  ;;  %s29_s21 = sadd.s32 1, %s1238_s18  ;;  %s1242_s19 = sphi %s1287_s19, %s14_s19   ;;  %s1238_s18 = sphi %s1285_s18, %s1398_s18   ;;  %s1234_s17 = sphi %s1283_s17, %s1397_s17   ;;  %s1230_s16 = sphi %s1281_s16, %s1396_s16   ;;  %s1226_s15 = sphi %s1279_s15, %s1395_s15  }
   0x4   : > { %p27_p0 = scmp.ge.s32.totalorder %s26_s20, 2  ;;  %p1092_p1 = scmp.ge.s32.totalorder %s1242_s19, 1 }
   0x5   : > { %p241_p2 = scmp.lt.s32.totalorder %s1242_s19, 5 }
   0x6   : > { %s1400_s20 = smov (%p27_p0, %s26_s20), 0  ;;  %s1402_s21 = smov (!%p27_p0, %s29_s21), %s1238_s18 }
   0x7   : > { %p242_p3 = pnand %p1092_p1, %p241_p2  ;;  %p31_p4 = scmp.ge.s32.totalorder %s1402_s21, 2 }
   0x8   : > { %s1309_s22 = sshll.u32 (!%p242_p3), %s1226_s15, 2  ;;  %p306_p5 = scmp.lt.s32.totalorder (!%p242_p3), %s1230_s16, 1 }
   0x9   : > { %s1404_s21 = smov (%p31_p4, %s1402_s21), 0  ;;  %245 = sbr.rel (%p242_p3) target bundleno = 395 (0x18b), region = 36 }
   0xa   : > { %p308_p6 = scmp.lt.s32.totalorder (!%p242_p3), %s1309_s22, 9  ;;  %s1129_s27 = sadd.s32 (!%p242_p3), 4, %s1309_s22 }
   0xb   : > { %p323_p7 = scmp.lt.s32.totalorder (!%p242_p3), %s1129_s27, 9  ;;  %s1245_s5 = smov (!%p242_p3), 60  }
   0xc   : > { %s1246_s6 = smov (!%p242_p3), 94   ;;  %s1247_s12 = smov (!%p242_p3), 62  }
   0xd   : > { %s1248_s13 = smov (!%p242_p3), 93   ;;  %s1249_s14 = smov (!%p242_p3), 61  }
   0xe   : > { %v381_v0 = vlaneseq  ;;  %v1244_v1 = vmov 1983009808   ;;  %s1406_s16 = smov (!%p306_p5, %s1230_s16), 1  ;;  %s1408_s27 = smov (!%p323_p7, %s1129_s27), 9  ;;  %v1253_v20 = vmov 0   ;;  %v769_v22 = vld [vmem:[%s1393_s3] sm:$0xff] }
   0xf   : > { %v379_v2 = vunpack.c.l.s4 %v1244_v1  ;;  %s309_s23 = scalar_select %p308_p6, %s1309_s22, 9  ;;  %873 = vmatprep.mubr.bf16.mxu0 %v1253_v20  ;;  %914 = vmatprep.mubr.bf16.mxu1 %v1253_v20  ;;  %vm406_vm0 = vcmask 1043458   ;;  %vm598_vm1 = vcmask 760838   ;;  %vm592_vm2 = vcmask 760832  }
  0x10   : > { %v382_v3 = vshrl.u32 %v381_v0, 7  ;;  %s1130_s24 = smul.u32 10, %s1406_s16  ;;  %s1250_s15 = smov 127   ;;  %1181 = vset.pattern.permute.xlu0 %v1253_v20  ;;  %vm599_vm3 = vmor %vm598_vm1, %vm406_vm0  ;;  %vm455_vm4 = vcmask 1041408   ;;  %vm741_vm5 = vcmask 488452   ;;  %vm551_vm6 = vcmask 766980  }
  0x11   : > { %v380_v4 = vunpack.c.0.s8 %v379_v2  ;;  %vm398_vm7 = vcmask 1043456   ;;  %vm735_vm8 = vcmask 490496   ;;  %vm742_vm9 = vmor %vm741_vm5, %vm455_vm4  ;;  %vm545_vm10 = vcmask 769024   ;;  %p344_p8 = scmp.lt.s32.totalorder %s1309_s22, 7  ;;  %s1098_s29 = sshll.u32 %s1406_s16, 3 }
  0x12   : > { %s311_s25 = sadd.s32 %s1130_s24, %s309_s23  ;;  %s326_s7 = sadd.s32 %s1130_s24, %s1408_s27  ;;  %vm552_vm11 = vmor %vm551_vm6, %vm455_vm4  ;;  %vm646_vm12 = vcmask 504836   ;;  %vm640_vm13 = vcmask 506880   ;;  %vm693_vm15 = vcmask 498694   ;;  %vm687_vm1 = vcmask 498688  }
  0x13   : > { %v383_v5 = vsub.s32 %v380_v4, %v382_v3  ;;  %s1094_s26 = sshll.u32 %s311_s25, 1  ;;  %s1096_s8 = sshll.u32 %s326_s7, 1  ;;  %vm647_vm14 = vmor %vm646_vm12, %vm455_vm4  ;;  %vm756_vm5 = vcmask 1041888   ;;  %vm400_vm6 = vcmask 1039360   ;;  %vm503_vm12 = vcmask 777222  }
  0x14   : > { %s313_s30 = scalar_lea.vmem %s1390_s0, %s1094_s26  ;;  %s1324_s11 = scalar_lea.vmem %s1391_s1, %s1096_s8 }
  0x15   : > { %v711_v6 = vld [vmem:[%s313_s30] sm:$0xff]  ;;  %s1251_s23 = smov 126   ;;  %s1252_s24 = smov 95  }
  0x16   : > { %v720_v7 = vrot.slane %v711_v6, %v383_v5  ;;  %v713_v8 = vcombine.high %v711_v6, %v711_v6  ;;  %1100 = vst.sshfl [vmem:[#allocation2] sm:$0xf pattern:$0x76325410] %v711_v6  ;;  %v570_v10 = vcombine.low %v711_v6, %v711_v6  ;;  %s1410_s22 = smov (!%p344_p8, %s1309_s22), 7 }
  0x17   : > { %v1105_v12 = vld.sshfl [vmem:[%s1324_s11] sm:$0x3 pattern:$0x76325410]  ;;  %s349_s30 = sadd.s32 %s1098_s29, %s1410_s22 }
  0x18   : > { %728 = vrot.lane.b32.xlu0 %v720_v7, %s1245_s5  ;;  %538 = vrot.lane.b32.xlu1 %v720_v7, %s1246_s6  ;;  %1101 = vst.sshfl [vmem:[#allocation2 + $0x8] sm:$0xf pattern:$0x76325410] %v713_v8  ;;  %v727_v9 = vrot.slane %v713_v8, %v383_v5  ;;  %v577_v11 = vrot.slane %v570_v10, %v383_v5 }
  0x19   : > { %v1184_v13 = vld [vmem:[%s1324_s11] ss:$0 sps:$4 sm:$0x33]  }
  0x1a   : > { %v610_v14 = vrot.slane %v1184_v13, %v383_v5  ;;  %v1185_v15 = vld [vmem:[%s1324_s11] ss:$0 sps:$4 sm:$0x33]  }
  0x1b   : > { %v1186_v16 = vld [vmem:[%s1324_s11] ss:$0 sps:$4 sm:$0x33]   ;;  %v705_v17 = vrot.slane %v1185_v15, %v383_v5 }
  0x1c   : > { %633 = vrot.lane.b32.xlu0 %v720_v7, %s1247_s12  ;;  %587 = vrot.lane.b32.xlu1 %v720_v7, %s1248_s13  ;;  %v419_v18 = vrot.slane %v1186_v16, %v383_v5  ;;  %v1187_v19 = vld [vmem:[%s1324_s11] ss:$0 sps:$4 sm:$0x33]  }
  0x1d   : > { %v515_v21 = vrot.slane %v1187_v19, %v383_v5 }
  0x20   : > { %730 = vrot.lane.b32.xlu0 %v727_v9, %s1245_s5  ;;  %540 = vrot.lane.b32.xlu1 %v727_v9, %s1246_s6 }
  0x24   : > { %585 = vrot.lane.b32.xlu0 %v577_v11, %s1248_s13  ;;  %635 = vrot.lane.b32.xlu1 %v727_v9, %s1247_s12 }
  0x28   : > { %680 = vrot.lane.b32.xlu0 %v577_v11, %s1249_s14  ;;  %682 = vrot.lane.b32.xlu1 %v720_v7, %s1249_s14 }
  0x2c   : > { %753 = vrot.lane.b32.xlu0 %v1105_v12, %s1245_s5  ;;  %392 = vrot.lane.b32.xlu1 %v577_v11, %s1250_s15  ;;  %s1099_s5 = sshll.u32 %s349_s30, 3 }
  0x2d   : > { %s351_s8 = scalar_lea.vmem %s1394_s4, %s1099_s5 }
  0x30   : > { %394 = vrot.lane.b32.xlu0 %v720_v7, %s1250_s15  ;;  %442 = vrot.lane.b32.xlu1 %v720_v7, %s1251_s23 }
  0x34   : > { %444 = vrot.lane.b32.xlu0 %v727_v9, %s1251_s23  ;;  %490 = vrot.lane.b32.xlu1 %v577_v11, %s1252_s24 }
  0x38   : > { %492 = vrot.lane.b32.xlu0 %v720_v7, %s1252_s24  ;;  %563 = vrot.lane.b32.xlu1 %v1105_v12, %s1246_s6 }
  0x3c   : > { %611 = vrot.lane.b32.xlu0 %v610_v14, %s1248_s13  ;;  %658 = vrot.lane.b32.xlu1 %v1105_v12, %s1247_s12 }
  0x40   : > { %706 = vrot.lane.b32.xlu0 %v705_v17, %s1249_s14  ;;  %420 = vrot.lane.b32.xlu1 %v419_v18, %s1250_s15 }
  0x44   : > { %468 = vrot.lane.b32.xlu0 %v1105_v12, %s1251_s23  ;;  %516 = vrot.lane.b32.xlu1 %v515_v21, %s1252_s24 }
  0x48   : > { %772 = vperm.xlu0 %1181, %v769_v22  }
  0x8a   : > { %v729_v23 = vpop.permute.xlu0 %728  ;;  %v539_v24 = vpop.permute.xlu1 %538 }
  0x8b   : > { %v732_v31 = vrot.slane %v729_v23, 4  ;;  %v542_v32 = vrot.slane %v539_v24, 4 }
  0x8e   : > { %v634_v25 = vpop.permute.xlu0 %633  ;;  %v588_v26 = vpop.permute.xlu1 %587 }
  0x8f   : > { %v590_v27 = vrot.slane %v588_v26, 4  ;;  %v637_v43 = vrot.slane %v634_v25, 4 }
  0x91   : > { %v594_v28 = vsel %vm592_vm2, %v588_v26, %v590_v27 }
  0x92   : > { %600 = vst.msk [vmem:[#allocation2 + $0x28] sm:$0xcc] %vm599_vm3, %v594_v28  ;;  %v731_v29 = vpop.permute.xlu0 %730  ;;  %v541_v30 = vpop.permute.xlu1 %540  ;;  %vm694_vm3 = vmor %vm693_vm15, %vm406_vm0 }
  0x93   : > { %v733_v33 = vrot.slane %v731_v29, 4  ;;  %v543_v34 = vrot.slane %v541_v30, 4  ;;  %vm504_vm15 = vmor %vm503_vm12, %vm406_vm0 }
  0x95   : > { %v734_v35 = vsel %vm398_vm7, %v732_v31, %v733_v33  ;;  %v737_v36 = vsel %vm735_vm8, %v731_v29, %v733_v33  ;;  %v544_v37 = vsel %vm398_vm7, %v542_v32, %v543_v34  ;;  %v547_v38 = vsel %vm545_vm10, %v541_v30, %v543_v34 }
  0x96   : > { %v736_v39 = vsel %vm735_vm8, %v729_v23, %v734_v35  ;;  %743 = vst.msk [vmem:[#allocation2 + $0x48] sm:$0x33] %vm742_vm9, %v737_v36  ;;  %v546_v40 = vsel %vm545_vm10, %v539_v24, %v544_v37  ;;  %v586_v41 = vpop.permute.xlu0 %585  ;;  %v636_v42 = vpop.permute.xlu1 %635  ;;  %vm456_vm9 = vcmask 1029124   ;;  %vm449_vm10 = vcmask 1031168   ;;  %v758_v35 = vld [vmem:[%s1392_s2] sm:$0xf] }
  0x97   : > { %553 = vst.msk [vmem:[#allocation2 + $0x28] sm:$0x33] %vm552_vm11, %v547_v38  ;;  %740 = vst [vmem:[#allocation2 + $0x40] sm:$0x33] %v736_v39  ;;  %v589_v44 = vrot.slane %v586_v41, 4  ;;  %v638_v45 = vrot.slane %v636_v42, 4 }
  0x98   : > { %550 = vst [vmem:[#allocation2 + $0x20] sm:$0x33] %v546_v40  ;;  %vm457_vm11 = vmor %vm456_vm9, %vm455_vm4 }
  0x99   : > { %v591_v46 = vsel %vm398_vm7, %v589_v44, %v590_v27  ;;  %v639_v47 = vsel %vm398_vm7, %v637_v43, %v638_v45  ;;  %v642_v48 = vsel %vm640_vm13, %v636_v42, %v638_v45 }
  0x9a   : > { %v593_v49 = vsel %vm592_vm2, %v586_v41, %v591_v46  ;;  %v641_v50 = vsel %vm640_vm13, %v634_v25, %v639_v47  ;;  %648 = vst.msk [vmem:[#allocation2 + $0x38] sm:$0x33] %vm647_vm14, %v642_v48  ;;  %v681_v51 = vpop.permute.xlu0 %680  ;;  %v683_v52 = vpop.permute.xlu1 %682  ;;  %vm407_vm2 = vcmask 1039366   ;;  %vm566_vm13 = vcmask 1042160  }
  0x9b   : > { %597 = vst [vmem:[#allocation2 + $0x20] sm:$0xcc] %v593_v49  ;;  %645 = vst [vmem:[#allocation2 + $0x30] sm:$0x33] %v641_v50  ;;  %v684_v53 = vrot.slane %v681_v51, 4  ;;  %v685_v54 = vrot.slane %v683_v52, 4 }
  0x9c   : > { %vm408_vm8 = vmor %vm407_vm2, %vm406_vm0  ;;  %vm497_vm14 = vcmask 777216   ;;  %vm471_vm0 = vcmask 1042416   ;;  %vm519_vm2 = vcmask 1044218  }
  0x9d   : > { %v686_v55 = vsel %vm398_vm7, %v684_v53, %v685_v54  ;;  %v689_v56 = vsel %vm687_vm1, %v683_v52, %v685_v54 }
  0x9e   : > { %v688_v57 = vsel %vm687_vm1, %v681_v51, %v686_v55  ;;  %695 = vst.msk [vmem:[#allocation2 + $0x38] sm:$0xcc] %vm694_vm3, %v689_v56  ;;  %v754_v58 = vpop.permute.xlu0 %753  ;;  %v393_v59 = vpop.permute.xlu1 %392  ;;  %v767_v60 = vld [vmem:[#allocation2 + $0x40] sm:$0x33]  ;;  %vm614_vm1 = vcmask 1044202   ;;  %vm661_vm3 = vcmask 1041904  }
  0x9f   : > { %692 = vst [vmem:[#allocation2 + $0x30] sm:$0xcc] %v688_v57  ;;  %757 = vst.msk [vmem:[#allocation2 + $0x4c] sm:$0x3] %vm756_vm5, %v754_v58  ;;  %v1115_v61 = vcombine.high %v767_v60, %v767_v60  ;;  %v1114_v62 = vcombine.low %v767_v60, %v767_v60  ;;  %v396_v2 = vrot.slane %v393_v59, 4  ;;  %vm423_vm5 = vcmask 1044474  }
  0xa1   : > { %1118 = vmatprep.subr.msk.bf16.mxu0 %vm455_vm4, %v1115_v61  ;;  %v830_v63 = vsel %vm455_vm4, %v1114_v62, 0 }
  0xa2   : > { %852 = vmatpush1.bf16.msra.mxu0 %v830_v63  ;;  %v395_v0 = vpop.permute.xlu0 %394  ;;  %v443_v1 = vpop.permute.xlu1 %442 }
  0xa3   : > { %v397_v3 = vrot.slane %v395_v0, 4  ;;  %v446_v11 = vrot.slane %v443_v1, 4 }
  0xa5   : > { %v399_v4 = vsel %vm398_vm7, %v396_v2, %v397_v3  ;;  %v402_v5 = vsel %vm400_vm6, %v395_v0, %v397_v3  ;;  %v1200_v37 = vld [vmem:[#allocation2 + $0x28] ss:$16 sps:$4 sm:$0xff]  }
  0xa6   : > { %v401_v6 = vsel %vm400_vm6, %v393_v59, %v399_v4  ;;  %409 = vst.msk [vmem:[#allocation2 + $0x8] sm:$0xcc] %vm408_vm8, %v402_v5  ;;  %v445_v7 = vpop.permute.xlu0 %444  ;;  %v491_v8 = vpop.permute.xlu1 %490  ;;  %v1190_v9 = vld [vmem:[#allocation2 + $0x24] ss:$16 sps:$4 sm:$0xff]   ;;  %v768_v10 = vld [vmem:[#allocation2 + $0x48] sm:$0x33] }
  0xa7   : > { %405 = vst [vmem:[#allocation2] sm:$0xcc] %v401_v6  ;;  %v447_v12 = vrot.slane %v445_v7, 4  ;;  %v1117_v13 = vcombine.high %v768_v10, %v768_v10  ;;  %v1193_v14 = vld [vmem:[#allocation2 + $0x20] ss:$16 sps:$4 sm:$0xff]   ;;  %v1116_v15 = vcombine.low %v768_v10, %v768_v10  ;;  %853 = vmatprep.subr.bf16.mxu0 %v1190_v9  ;;  %v494_v22 = vrot.slane %v491_v8, 4 }
  0xa8   : > { %854 = vmatpush1.bf16.msra.mxu0 %v1193_v14 }
  0xa9   : > { %v448_v16 = vsel %vm398_vm7, %v446_v11, %v447_v12  ;;  %v451_v17 = vsel %vm449_vm10, %v445_v7, %v447_v12  ;;  %1120 = vmatprep.subr.msk.bf16.mxu1 %vm455_vm4, %v1117_v13  ;;  %v836_v18 = vsel %vm455_vm4, %v1116_v15, 0  ;;  %vm709_vm4 = vcmask 1043946  }
  0xaa   : > { %v450_v19 = vsel %vm449_vm10, %v443_v1, %v448_v16  ;;  %458 = vst.msk [vmem:[#allocation2 + $0x18] sm:$0x33] %vm457_vm11, %v451_v17  ;;  %893 = vmatpush1.bf16.msra.mxu1 %v836_v18  ;;  %v493_v20 = vpop.permute.xlu0 %492  ;;  %v564_v21 = vpop.permute.xlu1 %563 }
  0xab   : > { %454 = vst [vmem:[#allocation2 + $0x10] sm:$0x33] %v450_v19  ;;  %v495_v23 = vrot.slane %v493_v20, 4  ;;  %567 = vst.msk [vmem:[#allocation2 + $0x2c] sm:$0x3] %vm566_vm13, %v564_v21 }
  0xad   : > { %v496_v24 = vsel %vm398_vm7, %v494_v22, %v495_v23  ;;  %v499_v25 = vsel %vm497_vm14, %v493_v20, %v495_v23  ;;  %vm825_vm7 = vcmask 293888  }
  0xae   : > { %v498_v26 = vsel %vm497_vm14, %v491_v8, %v496_v24  ;;  %505 = vst.msk [vmem:[#allocation2 + $0x18] sm:$0xcc] %vm504_vm15, %v499_v25  ;;  %v612_v27 = vpop.permute.xlu0 %611  ;;  %v659_v28 = vpop.permute.xlu1 %658 }
  0xaf   : > { %502 = vst [vmem:[#allocation2 + $0x10] sm:$0xcc] %v498_v26  ;;  %615 = vst.msk [vmem:[#allocation2 + $0x2c] sm:$0xc] %vm614_vm1, %v612_v27 }
  0xb0   : > { %662 = vst.msk [vmem:[#allocation2 + $0x3c] sm:$0x3] %vm661_vm3, %v659_v28 }
  0xb2   : > { %v707_v29 = vpop.permute.xlu0 %706  ;;  %v421_v30 = vpop.permute.xlu1 %420 }
  0xb3   : > { %710 = vst.msk [vmem:[#allocation2 + $0x3c] sm:$0xc] %vm709_vm4, %v707_v29 }
  0xb4   : > { %424 = vst.msk [vmem:[#allocation2 + $0xc] sm:$0xc] %vm423_vm5, %v421_v30 }
  0xb5   : > { %v1203_v39 = vld [vmem:[#allocation2 + $0x8] ss:$16 sps:$4 sm:$0xff]  }
  0xb6   : > { %v469_v31 = vpop.permute.xlu0 %468  ;;  %v517_v32 = vpop.permute.xlu1 %516  ;;  %v1195_v33 = vld [vmem:[#allocation2 + $0x4] ss:$16 sps:$4 sm:$0xff]   ;;  %v1197_v34 = vld [vmem:[#allocation2] ss:$16 sps:$4 sm:$0xff]  }
  0xb7   : > { %472 = vst.msk [vmem:[#allocation2 + $0x1c] sm:$0x3] %vm471_vm0, %v469_v31  ;;  %855 = vmatprep.subr.bf16.mxu0 %v1195_v33 }
  0xb8   : > { %520 = vst.msk [vmem:[#allocation2 + $0x1c] sm:$0xc] %vm519_vm2, %v517_v32  ;;  %856 = vmatpush1.bf16.msra.mxu0 %v1197_v34 }
  0xba   : > { %v1198_v36 = vld [vmem:[#allocation2 + $0x2c] ss:$16 sps:$4 sm:$0xff]  }
  0xbb   : > { %894 = vmatprep.subr.bf16.mxu1 %v1198_v36  ;;  %1119 = vmatmul.mubr.msk.bf16.vlgmr.msra.gmra.mxu0 %vm825_vm7, %v758_v35 }
  0xbc   : > { %895 = vmatpush1.bf16.msra.mxu1 %v1200_v37 }
  0xbf   : > { %v1201_v38 = vld [vmem:[#allocation2 + $0xc] ss:$16 sps:$4 sm:$0xff]  }
  0xc0   : > { %896 = vmatprep.subr.bf16.mxu1 %v1201_v38 }
  0xc1   : > { %897 = vmatpush1.bf16.msra.mxu1 %v1203_v39 }
  0xc3   : > { %v773_v40 = vpop.permute.xlu0 %772 }
  0xc4   : > { %1121 = vmatmul.mubr.msk.bf16.vlgmr.msra.gmra.mxu1 %vm825_vm7, %v758_v35 }
 0x17b   : > { %v875_v41 = vpop.f32.mrf.mxu0 }
 0x17c   : > { %v876_v42 = vadd.f32 %v875_v41, %v773_v40 }
 0x17d   : > { %v877_v43 = vpop.f32.mrf.mxu0 }
 0x17e   : > { %v878_v44 = vadd.f32 %v877_v43, %v773_v40  ;;  %923 = vst [vmem:[%s351_s8] sm:$0xff] %v876_v42 }
 0x17f   : > { %v879_v45 = vpop.f32.mrf.mxu0 }
 0x180   : > { %924 = vst [vmem:[%s351_s8 + $0x8] sm:$0xff] %v878_v44 }
 0x181   : > { %v880_v46 = vpop.f32.mrf.mxu0 }
 0x184   : > { %v916_v47 = vpop.f32.mrf.mxu1 }
 0x185   : > { %v917_v48 = vadd.f32 %v916_v47, %v773_v40 }
 0x186   : > { %v918_v49 = vpop.f32.mrf.mxu1 }
 0x187   : > { %925 = vst [vmem:[%s351_s8 + $0x10] sm:$0xff] %v917_v48  ;;  %v919_v50 = vadd.f32 %v918_v49, %v773_v40 }
 0x188   : > { %v920_v51 = vpop.f32.mrf.mxu1 }
 0x189   : > { %926 = vst [vmem:[%s351_s8 + $0x18] sm:$0xff] %v919_v50 }
 0x18a   : > { %v921_v52 = vpop.f32.mrf.mxu1 }
 0x18b PF: > { %s14_s19 = sadd.s32 1, %s1242_s19   ;;  %s1395_s15 = smov %s1234_s17 }
 0x18c   : > { %p11_p9 = scmp.ge.s32.totalorder %s14_s19, 6   ;;  %s1396_s16 = smov %s1238_s18 }
 0x18d   : > { %s1397_s17 = smov %s1400_s20  ;;  %s1398_s18 = smov %s1404_s21 }
 0x18e   :  { %13 = sbr.rel (!%p11_p9) target bundleno = 3 (0x3), region = 75 }

</bundles_post_ra>
